<compile_context>
chip_gen: v7x
topology: tpu7x:2x2x1
jax: 0.10.0
libtpu: 0.0.40
codegen_flags: <defaults>
</compile_context>

<pallas_src>
import jax
import jax.numpy as jnp
from jax.experimental import pallas as pl
from jax.experimental.pallas import tpu as pltpu

IN_FEATURES = 256
OUT_FEATURES = 10
DEFAULT_TILE_B = 8192          # 8 MiB per f32 x buffer
VMEM_LIMIT_BYTES = 32 << 20    # covers 2x8 MiB x buffers + outputs on all chips

# Minimum sublane multiple per element size (f32 -> 8, bf16 -> 16, int8/fp8 -> 32).
_SUBLANE_BY_ITEMSIZE = {4: 8, 2: 16, 1: 32}


def _round_up(n, m):
    return (n + m - 1) // m * m


def linear_kernel(x_ref, w_ref, b_ref, o_ref):
    # x_ref: (TILE_B, 256), w_ref: (256, 10), b_ref: (1, 10), o_ref: (TILE_B, 10)
    acc = jnp.dot(x_ref[...], w_ref[...], preferred_element_type=jnp.float32)
    o_ref[...] = (acc + b_ref[...]).astype(o_ref.dtype)


def linear_forward(x, weight, bias, *, tile_b=DEFAULT_TILE_B):
    """x: (B, 256); weight: (10, 256) (PyTorch layout); bias: (10,)."""
    B, F = x.shape
    assert F == IN_FEATURES, f"expected {IN_FEATURES} input features, got {F}"

    w_t = weight.T                       # (256, 10) — glue transpose, stays in JAX
    b2d = bias.reshape(1, OUT_FEATURES)  # (1, 10)

    # Tile size: dtype-aware sublane multiple, never (much) larger than B.
    sub = _SUBLANE_BY_ITEMSIZE.get(jnp.dtype(x.dtype).itemsize, 8)
    tb = min(_round_up(tile_b, sub), _round_up(B, sub))
    grid = pl.cdiv(B, tb)  # last block may be partial; Pallas masks OOB writeback

    itemsize = jnp.dtype(x.dtype).itemsize
    flops = 2 * B * IN_FEATURES * OUT_FEATURES
    bytes_accessed = (B * IN_FEATURES * itemsize            # read x
                      + B * OUT_FEATURES * itemsize         # write logits
                      + IN_FEATURES * OUT_FEATURES * jnp.dtype(weight.dtype).itemsize
                      + OUT_FEATURES * jnp.dtype(bias.dtype).itemsize)

    return pl.pallas_call(
        linear_kernel,
        out_shape=jax.ShapeDtypeStruct((B, OUT_FEATURES), x.dtype),
        grid=(grid,),
        in_specs=[
            pl.BlockSpec((tb, IN_FEATURES), lambda i: (i, 0)),            # x tiles
            pl.BlockSpec((IN_FEATURES, OUT_FEATURES), lambda i: (0, 0)),  # weight resident
            pl.BlockSpec((1, OUT_FEATURES), lambda i: (0, 0)),            # bias resident
        ],
        out_specs=pl.BlockSpec((tb, OUT_FEATURES), lambda i: (i, 0)),
        compiler_params=pltpu.CompilerParams(
            dimension_semantics=("parallel",),   # v7x megacore; neutral on v5e/v6e
            vmem_limit_bytes=VMEM_LIMIT_BYTES),
        cost_estimate=pl.CostEstimate(
            flops=flops, transcendentals=0, bytes_accessed=bytes_accessed),
    )(x, w_t, b2d)


if __name__ == "__main__":
    key = jax.random.PRNGKey(0)
    k_x, k_w, k_b, k_x2 = jax.random.split(key, 4)

    # Deterministic parameter init (mimics PyTorch's U(-1/sqrt(fan_in), +...)).
    bound = 1.0 / (IN_FEATURES ** 0.5)
    weight = jax.random.uniform(
        k_w, (OUT_FEATURES, IN_FEATURES), jnp.float32, -bound, bound)
    bias = jax.random.uniform(
        k_b, (OUT_FEATURES,), jnp.float32, -bound, bound)

    # Small example input: batch=8, features=256 (required by Linear(256, 10)).
    x = jax.random.normal(k_x, (8, IN_FEATURES), jnp.float32)
    logits = linear_forward(x, weight, bias)
    jax.block_until_ready(logits)
    ref = x @ weight.T + bias
    assert logits.shape == (8, OUT_FEATURES)
    assert jnp.allclose(logits, ref, atol=1e-5, rtol=1e-5)

    # Ragged batch (not a sublane multiple) exercises the partial-block path.
    x2 = jax.random.normal(k_x2, (300, IN_FEATURES), jnp.float32)
    logits2 = linear_forward(x2, weight, bias)
    jax.block_until_ready(logits2)
    ref2 = x2 @ weight.T + bias
    assert logits2.shape == (300, OUT_FEATURES)
    assert jnp.allclose(logits2, ref2, atol=1e-5, rtol=1e-5)

    print("KERNEL_OK")
</pallas_src>

<mosaic_0001>
module attributes {stable_mosaic.version = 11 : i64} {
  func.func @linear_kernel(%arg0: i32, %arg1: memref<8x256xf32, #tpu.memory_space<vmem>>, %arg2: memref<256x10xf32, #tpu.memory_space<vmem>>, %arg3: memref<1x10xf32, #tpu.memory_space<vmem>>, %arg4: memref<8x10xf32, #tpu.memory_space<vmem>>) attributes {dimension_semantics = [#tpu.dimension_semantics<parallel>], iteration_bounds = array<i64: 1>, scalar_prefetch = 0 : i64, scratch_operands = 0 : i64, tpu.core_type = #tpu.core_type<tc>, window_params = [{transform_indices = @transform_0, window_bounds = array<i64: 8, 256>}, {pipeline_mode = #tpu.pipeline_mode<synchronous>, transform_indices = @transform_1, window_bounds = array<i64: 256, 10>}, {pipeline_mode = #tpu.pipeline_mode<synchronous>, transform_indices = @transform_2, window_bounds = array<i64: 1, 10>}, {transform_indices = @transform_3, window_bounds = array<i64: 8, 10>}]} {
    %c0 = arith.constant 0 : index
    %c0_0 = arith.constant 0 : index
    %0 = vector.load %arg1[%c0, %c0_0] : memref<8x256xf32, #tpu.memory_space<vmem>>, vector<8x256xf32>
    %c0_1 = arith.constant 0 : index
    %c0_2 = arith.constant 0 : index
    %1 = vector.load %arg2[%c0_1, %c0_2] : memref<256x10xf32, #tpu.memory_space<vmem>>, vector<256x10xf32>
    %cst = arith.constant dense<0.000000e+00> : vector<8x10xf32>
    %2 = tpu.matmul %0, %1, %cst {dimension_numbers = #tpu.dot_dimension_numbers<[1], [0], [0], [1], [0, 0, 1, 1], [], []>} : vector<8x256xf32>, vector<256x10xf32>, vector<8x10xf32> -> vector<8x10xf32>
    %c0_3 = arith.constant 0 : index
    %c0_4 = arith.constant 0 : index
    %3 = vector.load %arg3[%c0_3, %c0_4] : memref<1x10xf32, #tpu.memory_space<vmem>>, vector<1x10xf32>
    %4 = vector.broadcast %3 : vector<1x10xf32> to vector<8x10xf32>
    %5 = arith.addf %2, %4 : vector<8x10xf32>
    %c0_5 = arith.constant 0 : index
    %c0_6 = arith.constant 0 : index
    %6 = vector.load %arg4[%c0_5, %c0_6] : memref<8x10xf32, #tpu.memory_space<vmem>>, vector<8x10xf32>
    tpu.vector_store %arg4[%c0_5, %c0_6], %5 {strides = array<i32>} : memref<8x10xf32, #tpu.memory_space<vmem>>, vector<8x10xf32>,
    return
  }
  func.func @transform_0(%arg0: i32) -> (i32, i32) {
    %c0_i32 = arith.constant 0 : i32
    %c0_i32_0 = arith.constant 0 : i32
    return %arg0, %c0_i32 : i32, i32
  }
  func.func @transform_1(%arg0: i32) -> (i32, i32) {
    %c0_i32 = arith.constant 0 : i32
    %c0_i32_0 = arith.constant 0 : i32
    %c0_i32_1 = arith.constant 0 : i32
    return %c0_i32, %c0_i32_0 : i32, i32
  }
  func.func @transform_2(%arg0: i32) -> (i32, i32) {
    %c0_i32 = arith.constant 0 : i32
    %c0_i32_0 = arith.constant 0 : i32
    %c0_i32_1 = arith.constant 0 : i32
    return %c0_i32, %c0_i32_0 : i32, i32
  }
  func.func @transform_3(%arg0: i32) -> (i32, i32) {
    %c0_i32 = arith.constant 0 : i32
    %c0_i32_0 = arith.constant 0 : i32
    return %arg0, %c0_i32 : i32, i32
  }
}

</mosaic_0001>

<bundles_post_ra>
// kernel: tpu_custom_call.1
= control target key start
LH: loop header
LB: loop body
LE: loop exit
PB: predicated region body
PF: predicated region fallthrough
CT: control target
= control target key end

     0   :  { %s373_s0 = inlined_call_operand.vmem [shape: f32[8,256], index: 0, kind: input, shape index: {}]   ;;  %s374_s1 = inlined_call_operand.vmem [shape: f32[256,10], index: 1, kind: input, shape index: {}]   ;;  %s375_s2 = inlined_call_operand.vmem [shape: f32[1,10], index: 2, kind: input, shape index: {}]   ;;  %s376_s3 = inlined_call_operand.hbm [shape: f32[8,10], index: 3, kind: output, shape index: {}]  }
   0x1   :  { %v33_v0 = vld [vmem:[%s374_s1 + $0x80] sm:$0xff]  ;;  %v34_v1 = vld [vmem:[%s374_s1 + $0x88] sm:$0xff]  ;;  %v35_v5 = vld [vmem:[%s374_s1 + $0x90] sm:$0xff] }
   0x2   :  { %v17_v2 = vld [vmem:[%s374_s1] sm:$0xff]  ;;  %v178_v3 = vpack.c.bf16 %v34_v1, %v33_v0  ;;  %v18_v4 = vld [vmem:[%s374_s1 + $0x8] sm:$0xff]  ;;  %v36_v6 = vld [vmem:[%s374_s1 + $0x98] sm:$0xff] }
   0x3   :  { %v180_v7 = vpack.c.bf16 %v18_v4, %v17_v2  ;;  %v182_v8 = vpack.c.bf16 %v36_v6, %v35_v5  ;;  %v19_v9 = vld [vmem:[%s374_s1 + $0x10] sm:$0xff]  ;;  %v20_v10 = vld [vmem:[%s374_s1 + $0x18] sm:$0xff]  ;;  %v37_v11 = vld [vmem:[%s374_s1 + $0xa0] sm:$0xff] }
   0x4   :  { %179 = vmatprep.subr.bf16.mxu0 %v178_v3  ;;  %v38_v12 = vld [vmem:[%s374_s1 + $0xa8] sm:$0xff]  ;;  %v184_v13 = vpack.c.bf16 %v20_v10, %v19_v9  ;;  %v21_v15 = vld [vmem:[%s374_s1 + $0x20] sm:$0xff]  ;;  %v39_v17 = vld [vmem:[%s374_s1 + $0xb0] sm:$0xff] }
   0x5   :  { %181 = vmatpush3.bf16.msra.mxu0 %v180_v7  ;;  %v186_v14 = vpack.c.bf16 %v38_v12, %v37_v11  ;;  %v22_v16 = vld [vmem:[%s374_s1 + $0x28] sm:$0xff]  ;;  %v40_v18 = vld [vmem:[%s374_s1 + $0xb8] sm:$0xff]  ;;  %v23_v21 = vld [vmem:[%s374_s1 + $0x30] sm:$0xff] }
   0x6   :  { %183 = vmatprep.subr.bf16.mxu0 %v182_v8  ;;  %v188_v19 = vpack.c.bf16 %v22_v16, %v21_v15  ;;  %v190_v20 = vpack.c.bf16 %v40_v18, %v39_v17  ;;  %v24_v22 = vld [vmem:[%s374_s1 + $0x38] sm:$0xff]  ;;  %v41_v23 = vld [vmem:[%s374_s1 + $0xc0] sm:$0xff]  ;;  %v42_v24 = vld [vmem:[%s374_s1 + $0xc8] sm:$0xff] }
   0x7   :  { %v16_v25 = vld [vmem:[%s373_s0 + $0x8] sm:$0xff] }
   0x8   :  { %120 = vmatprep.mubr.f32.mxu0 %v16_v25 }
   0x9   :  { %185 = vmatpush3.bf16.msra.mxu0 %v184_v13 }
   0xa   :  { %187 = vmatprep.subr.bf16.mxu0 %v186_v14 }
   0xb   :  { %8 = vsyncpa [#allocation3], 0  ;;  %v192_v26 = vpack.c.bf16 %v24_v22, %v23_v21  ;;  %v194_v27 = vpack.c.bf16 %v42_v24, %v41_v23  ;;  %v25_v28 = vld [vmem:[%s374_s1 + $0x40] sm:$0xff]  ;;  %v26_v29 = vld [vmem:[%s374_s1 + $0x48] sm:$0xff]  ;;  %s235_s28 = smov [#allocation2]   ;;  %vm126_vm0 = vcmask 80896  }
   0xc   :  { %v43_v30 = vld [vmem:[%s374_s1 + $0xd0] sm:$0xff]  ;;  %v44_v31 = vld [vmem:[%s374_s1 + $0xd8] sm:$0xff]  ;;  %v196_v32 = vpack.c.bf16 %v26_v29, %v25_v28  ;;  %v45_v36 = vld [vmem:[%s374_s1 + $0xe0] sm:$0xff]  ;;  %s134_s29 = sshll.u32 %s235_s28, 4  ;;  %s135_s29 = int_to_ptr.vmem [resolvable:$true] %s134_s29 }
   0xd   :  { %189 = vmatpush3.bf16.msra.mxu0 %v188_v19  ;;  %v198_v33 = vpack.c.bf16 %v44_v31, %v43_v30  ;;  %v27_v34 = vld [vmem:[%s374_s1 + $0x50] sm:$0xff]  ;;  %v28_v35 = vld [vmem:[%s374_s1 + $0x58] sm:$0xff]  ;;  %v46_v37 = vld [vmem:[%s374_s1 + $0xe8] sm:$0xff]  ;;  %p216_p1 = scmp.lt.s32.totalorder %s135_s29, %s135_s29 }
   0xe   :  { %191 = vmatprep.subr.bf16.mxu0 %v190_v20  ;;  %v200_v38 = vpack.c.bf16 %v28_v35, %v27_v34  ;;  %v202_v39 = vpack.c.bf16 %v46_v37, %v45_v36  ;;  %v29_v40 = vld [vmem:[%s374_s1 + $0x60] sm:$0xff]  ;;  %v30_v41 = vld [vmem:[%s374_s1 + $0x68] sm:$0xff]  ;;  %v47_v42 = vld [vmem:[%s374_s1 + $0xf0] sm:$0xff] }
   0xf   :  { %v48_v43 = vld [vmem:[%s374_s1 + $0xf8] sm:$0xff]  ;;  %v204_v44 = vpack.c.bf16 %v30_v41, %v29_v40  ;;  %v31_v46 = vld [vmem:[%s374_s1 + $0x70] sm:$0xff]  ;;  %v15_v49 = vld [vmem:[%s373_s0] sm:$0xff] }
  0x10   :  { %v206_v45 = vpack.c.bf16 %v48_v43, %v47_v42  ;;  %v32_v47 = vld [vmem:[%s374_s1 + $0x78] sm:$0xff]  ;;  %v142_v51 = vld [vmem:[%s375_s2] ss:$0 sm:$0xff]  ;;  %s211_s1 = scalar_lea.vmem %s135_s29, 128 }
  0x11   :  { %193 = vmatpush3.bf16.msra.mxu0 %v192_v26  ;;  %v208_v48 = vpack.c.bf16 %v32_v47, %v31_v46  ;;  %p212_p0 = scmp.ne.s32.totalorder %s135_s29, %s211_s1  ;;  %p217_p2 = scmp.lt.s32.totalorder %s211_s1, %s211_s1 }
  0x12   :  { %195 = vmatprep.subr.bf16.mxu0 %v194_v27 }
  0x13   :  { %p218_p3 = por %p217_p2, %p216_p1 }
  0x15   :  { %197 = vmatpush3.bf16.msra.mxu0 %v196_v32  ;;  %p219_p4 = pnand %p218_p3, %p212_p0 }
  0x16   :  { %199 = vmatprep.subr.bf16.mxu0 %v198_v33 }
  0x19   :  { %201 = vmatpush3.bf16.msra.mxu0 %v200_v38 }
  0x1a   :  { %203 = vmatprep.subr.bf16.mxu0 %v202_v39 }
  0x1d   :  { %205 = vmatpush3.bf16.msra.mxu0 %v204_v44 }
  0x1e   :  { %207 = vmatprep.subr.bf16.mxu0 %v206_v45 }
  0x21   :  { %209 = vmatpush3.bf16.msra.mxu0 %v208_v48 }
  0x24   :  { %121 = vmatmul.mubr.f32.vlgmr.msra.gmra.mrb[0].mxu0 %v15_v49 }
  0xf7   :  { %v175_v50 = vpop.f32.mrb[0].mxu0 }
  0xf8   :  { %v176_v52 = vpop.f32.mrb[1].mxu0 }
  0xf9   :  { %v177_v53 = vadd.f32 %v176_v52, %v175_v50 }
  0xfb   :  { %v123_v54 = vadd.f32 %v177_v53, %v142_v51 }
  0xfd   :  { %127 = vst.msk [vmem:[#allocation2] sm:$0xff] %vm126_vm0, %v123_v54 }
  0xfe   :  { %222 = shalt.err (!%p219_p4)
}
  0xff   :  { %s223_s4 = scalar_lea.hbm %s376_s3, 128 }
 0x100   :  { %p224_p5 = scmp.ne.s32.totalorder %s376_s3, %s223_s4  ;;  %p227_p6 = scmp.lt.u32.totalorder %s223_s4, %s376_s3 }
 0x102   :  { %p229_p7 = pnand %p227_p6, %p224_p5 }
 0x104   :  { %232 = shalt.err (!%p229_p7)
}
 0x105   :  { %137 = dma.vmem_to_hbm [thread:$0]  %s135_s29, 128, %s376_s3, [#allocation3]  }
 0x106   :  { %233 = dma.done.wait [#allocation3], 128  }
 0x107   :  { %234 = vsyncadd [#allocation3], 4294967168 }
 0x108   :  { %141 = vsyncpa [#allocation3], 1 }

</bundles_post_ra>
